<compile_context>
chip_gen: v7x
topology: tpu7x:2x2x1
jax: 0.10.0
libtpu: 0.0.40
codegen_flags: <defaults>
</compile_context>

<pallas_src>
import jax
import jax.numpy as jnp
from jax.experimental import pallas as pl
from jax.experimental.pallas import tpu as pltpu


def _pick_tb(batch, seq, hidden, itemsize, budget_bytes):
    """Largest divisor of `batch` whose (TB, seq, hidden) tile fits the VMEM
    budget, preferring to keep >= 2 grid steps (megacore sharding on v7x)."""
    bytes_per_row = max(seq * hidden * itemsize, 1)
    max_tb = max(1, min(batch, budget_bytes // bytes_per_row))
    fits = [d for d in range(1, max_tb + 1) if batch % d == 0]
    if not fits:
        return 1
    multi = [d for d in fits if batch // d >= 2]
    return max(multi) if multi else max(fits)


def _attention_kernel(x_ref, w_ref, b_ref, out_ref, attn_ref):
    """Single-query flash-style attention pooling over one (TB, S, H) slab.

    x_ref:    (TB, S, H) VMEM   -- inputs tile
    w_ref:    (1, 1, H)  VMEM   -- nn.Linear(hidden_dim, 1).weight
    b_ref:    (1,)       SMEM   -- nn.Linear(hidden_dim, 1).bias (scalar)
    out_ref:  (TB, 1, H) VMEM   -- pooled outputs
    attn_ref: (TB, 1, S) VMEM   -- attention weights, lane-dense over S
    """
    x = x_ref[...]                                             # (TB, S, H)
    tb, _, h = x.shape
    w = jnp.broadcast_to(w_ref[...], (tb, 1, h))               # (TB, 1, H)
    bias = b_ref[0]                                            # SMEM scalar

    # Scores over H on the MXU; result is lane-dense: (TB, 1, S).
    scores = jnp.einsum("bqh,bsh->bqs", w, x,
                        preferred_element_type=jnp.float32) + bias

    # Numerically-stable softmax over the sequence (lane) axis; normalization
    # deferred to one reciprocal at the end.
    m = jnp.max(scores, axis=-1, keepdims=True)                # (TB, 1, 1)
    e = jnp.exp(scores - m)                                    # (TB, 1, S)
    denom = jnp.sum(e, axis=-1, keepdims=True)                 # (TB, 1, 1)
    # Exact reciprocal keeps the 1e-5 tolerance (approx=True -> EUP vrcp if
    # the precision budget ever allows it).
    inv = pl.reciprocal(denom, approx=False)                   # (TB, 1, 1)

    # Weighted sum over S on the MXU: (TB,1,S) . (TB,S,H) -> (TB,1,H).
    acc = jnp.einsum("bqs,bsh->bqh", e, x,
                     preferred_element_type=jnp.float32)

    out_ref[...] = (acc * inv).astype(out_ref.dtype)           # (TB, 1, H)
    attn_ref[...] = (e * inv).astype(attn_ref.dtype)           # (TB, 1, S)


def attention_forward(inputs, weight, bias, *, tile_budget_bytes=4 * 1024 * 1024):
    """inputs: (B, S, H) f32; weight: (1, H) torch Linear layout; bias: (1,).

    Returns (outputs (B, H), attention_weights (B, S, 1)), matching the
    PyTorch module's forward.
    """
    B, S, H = inputs.shape
    x = inputs.astype(jnp.float32)
    w = weight.reshape(1, 1, H).astype(jnp.float32)
    b = bias.reshape(1).astype(jnp.float32)

    tb = _pick_tb(B, S, H, x.dtype.itemsize, tile_budget_bytes)
    grid = (B // tb,)

    grid_spec = pltpu.PrefetchScalarGridSpec(
        num_scalar_prefetch=0,
        grid=grid,
        in_specs=[
            # (TB, S, H) batch slab of the inputs.
            pl.BlockSpec((tb, S, H), lambda i: (i, 0, 0)),
            # Linear weight: constant index_map -> DMA'd once, stays resident.
            pl.BlockSpec((1, 1, H), lambda i: (0, 0, 0)),
            # Linear bias: scalar in SMEM (no padded VMEM tile, no vld).
            pl.BlockSpec(memory_space=pltpu.MemorySpace.SMEM),
        ],
        out_specs=[
            pl.BlockSpec((tb, 1, H), lambda i: (i, 0, 0)),     # pooled outputs
            pl.BlockSpec((tb, 1, S), lambda i: (i, 0, 0)),     # attn weights
        ],
    )

    out_shape = (
        jax.ShapeDtypeStruct((B, 1, H), jnp.float32),
        jax.ShapeDtypeStruct((B, 1, S), jnp.float32),
    )

    outputs3, attn3 = pl.pallas_call(
        _attention_kernel,
        out_shape=out_shape,
        grid_spec=grid_spec,
        compiler_params=pltpu.CompilerParams(
            dimension_semantics=("parallel",),
            vmem_limit_bytes=32 * 1024 * 1024,
        ),
    )(x, w, b)

    # Layout plumbing only (metadata reshapes): (B,1,H)->(B,H) and the
    # lane-dense (B,1,S) weights back to the torch (B,S,1) layout.
    return outputs3.reshape(B, H), attn3.reshape(B, S, 1)


def _reference(x, weight, bias):
    scores = jnp.einsum("bsh,oh->bso", x, weight) + bias        # (B, S, 1)
    weights = jax.nn.softmax(scores, axis=1)
    outputs = jnp.sum(x * weights, axis=1)
    return outputs, weights


def _run_case(key, B, S, H):
    kx, kw, kb = jax.random.split(key, 3)
    x = jax.random.normal(kx, (B, S, H), dtype=jnp.float32)
    # Deterministic "nn.Linear(hidden_dim, 1)" parameters (torch layout).
    weight = jax.random.normal(kw, (1, H), dtype=jnp.float32) * 0.1
    bias = jax.random.normal(kb, (1,), dtype=jnp.float32) * 0.1

    outputs, attn_weights = attention_forward(x, weight, bias)
    jax.block_until_ready((outputs, attn_weights))

    ref_out, ref_w = _reference(x, weight, bias)
    assert outputs.shape == (B, H) and attn_weights.shape == (B, S, 1)
    assert jnp.allclose(outputs, ref_out, atol=1e-5, rtol=1e-5)
    assert jnp.allclose(attn_weights, ref_w, atol=1e-5, rtol=1e-5)


if __name__ == "__main__":
    key = jax.random.PRNGKey(0)
    k1, k2 = jax.random.split(key)
    # Primary small-shape check consistent with the module (batch=2, seq=8,
    # hidden_dim=32).
    _run_case(k1, B=2, S=8, H=32)
    # Secondary check exercising TB>1 / multi-step grid with aligned dims.
    _run_case(k2, B=4, S=128, H=256)

    print("KERNEL_OK")
</pallas_src>

<mosaic_0001>
module attributes {stable_mosaic.version = 11 : i64} {
  func.func @_attention_kernel(%arg0: i32, %arg1: memref<1x8x32xf32, #tpu.memory_space<vmem>>, %arg2: memref<1x1x32xf32, #tpu.memory_space<vmem>>, %arg3: memref<1xf32, #tpu.memory_space<smem>>, %arg4: memref<1x1x32xf32, #tpu.memory_space<vmem>>, %arg5: memref<1x1x8xf32, #tpu.memory_space<vmem>>) attributes {dimension_semantics = [#tpu.dimension_semantics<parallel>], iteration_bounds = array<i64: 2>, scalar_prefetch = 0 : i64, scratch_operands = 0 : i64, tpu.core_type = #tpu.core_type<tc>, window_params = [{transform_indices = @transform_0, window_bounds = array<i64: 1, 8, 32>}, {pipeline_mode = #tpu.pipeline_mode<synchronous>, transform_indices = @transform_1, window_bounds = array<i64: 1, 1, 32>}, {transform_indices = @transform_2, window_bounds = array<i64: 1>}, {transform_indices = @transform_3, window_bounds = array<i64: 1, 1, 32>}, {transform_indices = @transform_4, window_bounds = array<i64: 1, 1, 8>}]} {
    %c0 = arith.constant 0 : index
    %c0_0 = arith.constant 0 : index
    %c0_1 = arith.constant 0 : index
    %0 = vector.load %arg1[%c0, %c0_0, %c0_1] : memref<1x8x32xf32, #tpu.memory_space<vmem>>, vector<1x8x32xf32>
    %c0_2 = arith.constant 0 : index
    %c0_3 = arith.constant 0 : index
    %c0_4 = arith.constant 0 : index
    %1 = vector.load %arg2[%c0_2, %c0_3, %c0_4] : memref<1x1x32xf32, #tpu.memory_space<vmem>>, vector<1x1x32xf32>
    %c0_5 = arith.constant 0 : index
    %2 = memref.load %arg3[%c0_5] : memref<1xf32, #tpu.memory_space<smem>>
    "tpu.trace_start"() <{level = 10 : i32, message = "bqh,bsh->bqs"}> : () -> ()
    %cst = arith.constant dense<0.000000e+00> : vector<1x1x8xf32>
    %3 = tpu.matmul %1, %0, %cst {dimension_numbers = #tpu.dot_dimension_numbers<[2], [2], [1], [1], [0, 0, 0, 1, 1, 1], [0], [0]>} : vector<1x1x32xf32>, vector<1x8x32xf32>, vector<1x1x8xf32> -> vector<1x1x8xf32>
    "tpu.trace_stop"() : () -> ()
    %4 = vector.broadcast %2 : f32 to vector<1x1x8xf32>
    %5 = arith.addf %3, %4 : vector<1x1x8xf32>
    %cst_6 = arith.constant dense<0xFF800000> : vector<1x1xf32>
    %6 = vector.multi_reduction <maximumf>, %5, %cst_6 [2] : vector<1x1x8xf32> to vector<1x1xf32>
    %7 = vector.shape_cast %6 : vector<1x1xf32> to vector<1x1x1xf32>
    %8 = vector.broadcast %7 : vector<1x1x1xf32> to vector<1x1x8xf32>
    %9 = arith.subf %5, %8 : vector<1x1x8xf32>
    %10 = math.exp %9 : vector<1x1x8xf32>
    %cst_7 = arith.constant dense<0.000000e+00> : vector<1x1xf32>
    %11 = vector.multi_reduction <add>, %10, %cst_7 [2] : vector<1x1x8xf32> to vector<1x1xf32>
    %12 = vector.shape_cast %11 : vector<1x1xf32> to vector<1x1x1xf32>
    %13 = tpu.reciprocal %12 : vector<1x1x1xf32> -> vector<1x1x1xf32>
    "tpu.trace_start"() <{level = 10 : i32, message = "bqs,bsh->bqh"}> : () -> ()
    %cst_8 = arith.constant dense<0.000000e+00> : vector<1x1x32xf32>
    %14 = tpu.matmul %10, %0, %cst_8 {dimension_numbers = #tpu.dot_dimension_numbers<[2], [1], [1], [2], [0, 0, 0, 1, 1, 2], [0], [0]>} : vector<1x1x8xf32>, vector<1x8x32xf32>, vector<1x1x32xf32> -> vector<1x1x32xf32>
    "tpu.trace_stop"() : () -> ()
    %15 = vector.broadcast %13 : vector<1x1x1xf32> to vector<1x1x32xf32>
    %16 = arith.mulf %14, %15 : vector<1x1x32xf32>
    %c0_9 = arith.constant 0 : index
    %c0_10 = arith.constant 0 : index
    %c0_11 = arith.constant 0 : index
    %17 = vector.load %arg4[%c0_9, %c0_10, %c0_11] : memref<1x1x32xf32, #tpu.memory_space<vmem>>, vector<1x1x32xf32>
    tpu.vector_store %arg4[%c0_9, %c0_10, %c0_11], %16 {strides = array<i32>} : memref<1x1x32xf32, #tpu.memory_space<vmem>>, vector<1x1x32xf32>,
    %18 = vector.broadcast %13 : vector<1x1x1xf32> to vector<1x1x8xf32>
    %19 = arith.mulf %10, %18 : vector<1x1x8xf32>
    %c0_12 = arith.constant 0 : index
    %c0_13 = arith.constant 0 : index
    %c0_14 = arith.constant 0 : index
    %20 = vector.load %arg5[%c0_12, %c0_13, %c0_14] : memref<1x1x8xf32, #tpu.memory_space<vmem>>, vector<1x1x8xf32>
    tpu.vector_store %arg5[%c0_12, %c0_13, %c0_14], %19 {strides = array<i32>} : memref<1x1x8xf32, #tpu.memory_space<vmem>>, vector<1x1x8xf32>,
    return
  }
  func.func @transform_0(%arg0: i32) -> (i32, i32, i32) {
    %c0_i32 = arith.constant 0 : i32
    %c0_i32_0 = arith.constant 0 : i32
    %c0_i32_1 = arith.constant 0 : i32
    return %arg0, %c0_i32, %c0_i32_0 : i32, i32, i32
  }
  func.func @transform_1(%arg0: i32) -> (i32, i32, i32) {
    %c0_i32 = arith.constant 0 : i32
    %c0_i32_0 = arith.constant 0 : i32
    %c0_i32_1 = arith.constant 0 : i32
    %c0_i32_2 = arith.constant 0 : i32
    return %c0_i32, %c0_i32_0, %c0_i32_1 : i32, i32, i32
  }
  func.func @transform_2(%arg0: i32) -> i32 {
    %c0_i32 = arith.constant 0 : i32
    %c0_i32_0 = arith.constant 0 : i32
    return %c0_i32 : i32
  }
  func.func @transform_3(%arg0: i32) -> (i32, i32, i32) {
    %c0_i32 = arith.constant 0 : i32
    %c0_i32_0 = arith.constant 0 : i32
    %c0_i32_1 = arith.constant 0 : i32
    return %arg0, %c0_i32, %c0_i32_0 : i32, i32, i32
  }
  func.func @transform_4(%arg0: i32) -> (i32, i32, i32) {
    %c0_i32 = arith.constant 0 : i32
    %c0_i32_0 = arith.constant 0 : i32
    %c0_i32_1 = arith.constant 0 : i32
    return %arg0, %c0_i32, %c0_i32_0 : i32, i32, i32
  }
}

</mosaic_0001>

<bundles_post_ra>
// kernel: tpu_custom_call.1
= control target key start
LH: loop header
LB: loop body
LE: loop exit
PB: predicated region body
PF: predicated region fallthrough
CT: control target
= control target key end

     0   :  { %s968_s0 = inlined_call_operand.hbm [shape: f32[2,8,32], index: 0, kind: input, shape index: {}]   ;;  %s969_s1 = inlined_call_operand.vmem [shape: f32[1,1,32], index: 1, kind: input, shape index: {}]   ;;  %s970_s2 = inlined_call_operand.<no memory space> [shape: f32[1], index: 2, kind: input, shape index: {}]   ;;  %s971_s3 = inlined_call_operand.hbm [shape: f32[2,1,32], index: 3, kind: output, shape index: {0}]   ;;  %s972_s4 = inlined_call_operand.hbm [shape: f32[2,1,8], index: 4, kind: output, shape index: {1}]  }
   0x1   :  { %10 = sst [smem:[#allocation2]] %s970_s2 }
   0x2   :  { %11 = vsyncpa [#allocation4], 0 }
   0x3   :  { %13 = vsyncpa [#allocation4 + $0x1], 0 }
   0x4   :  { %14 = vsyncpa [#allocation5], 0 }
   0x5   :  { %16 = vsyncpa [#allocation5 + $0x1], 0 }
   0x6   :  { %17 = vsyncpa [#allocation8], 0 }
   0x7   :  { %19 = vsyncpa [#allocation8 + $0x1], 0  ;;  %s766_s17 = smov 0   ;;  %s768_s18 = smov 0  }
   0x8   :  { %s770_s19 = smov 0   ;;  %s772_s20 = smov 0  }
   0x9 LB: > { %s787_s2 = sadd.s32 4294967295, %s731_s20   ;;  %s518_s21 = sadd.s32 4294967294, %s731_s20   ;;  %s731_s20 = sphi %s772_s20, %s987_s20   ;;  %s727_s19 = sphi %s770_s19, %s986_s19   ;;  %s723_s18 = sphi %s768_s18, %s985_s18   ;;  %s719_s17 = sphi %s766_s17, %s984_s17  }
   0xa   : > { %s791_s22 = sadd.s32 1, %s731_s20   ;;  %s32_s23 = sadd.s32 1, %s727_s19 }
   0xb   : > { %s29_s24 = ssub.s32 %s731_s20, %s791_s22  ;;  %p39_p0 = scmp.ne.s32.totalorder %s727_s19, %s723_s18 }
   0xc   : > { %p30_p1 = scmp.eq.s32.totalorder %s29_s24, 0  ;;  %p40_p2 = scmp.eq.s32.totalorder %s731_s20, 0 }
   0xd   : > { %p45_p3 = scmp.ne.s32.totalorder %s723_s18, %s719_s17  ;;  %p46_p4 = scmp.eq.s32.totalorder %s787_s2, 0 }
   0xe   : > { %s803_s25 = scalar_select %p30_p1, %s727_s19, %s32_s23  }
   0xf   : > { %p805_p5 = por %p40_p2, %p39_p0  ;;  %p809_p6 = por %p46_p4, %p45_p3 }
  0x10   : > { %p111_p7 = scmp.eq.s32.totalorder %s787_s2, 1  ;;  %p117_p8 = scmp.eq.s32.totalorder %s518_s21, 1 }
  0x11   : > { %p563_p10 = scmp.lt.s32.totalorder %s731_s20, 2  ;;  %s169_s30 = sand.u32 1, %s727_s19  }
  0x12   : > { %p816_p11 = por %p111_p7, %p39_p0  ;;  %p820_p12 = por %p117_p8, %p45_p3 }
  0x13   : > { %s522_s5 = sshll.u32 %s731_s20, 7  ;;  %s521_s6 = sshll.u32 %s169_s30, 3 }
  0x14   : > { %s976_s28 = scalar_select %p816_p11, 1, 0 }
  0x15   : > { %s977_s29 = scalar_select %p820_p12, 1, 0 }
  0x16   : > { %s829_s9 = scalar_lea.hbm %s968_s0, %s522_s5  ;;  %s173_s10 = scalar_lea.vmem [#allocation3], %s521_s6 }
  0x17   : > { %s180_s11 = sshll.u32 %s173_s10, 4  ;;  %p833_p13 = pnand %p563_p10, %p805_p5  ;;  %s837_s11 = int_to_ptr.vmem [resolvable:$true] %s180_s11 }
  0x18   : > { %s170_s13 = scalar_lea.sflag [#allocation4], %s169_s30  ;;  %s603_s14 = scalar_lea.hbm %s829_s9, 128 }
  0x19   : > { %p604_p2 = scmp.ne.s32.totalorder %s829_s9, %s603_s14  ;;  %p605_p3 = pneg %p833_p13 }
  0x1a   : > { %s608_s21 = scalar_lea.hbm %s968_s0, 256  ;;  %p609_p5 = scmp.lt.u32.totalorder %s829_s9, %s968_s0 }
  0x1b   : > { %p606_p4 = pnand %p605_p3, %p604_p2  ;;  %p610_p8 = scmp.lt.u32.totalorder %s608_s21, %s603_s14 }
  0x1c   : > { %p612_p9 = scmp.lt.u32.totalorder %s603_s14, %s829_s9 }
  0x1d   : > { %p607_p7 = pneg %p606_p4  ;;  %p611_p10 = por %p610_p8, %p609_p5 }
  0x1f   : > { %p613_p0 = por %p612_p9, %p611_p10 }
  0x21   : > { %p614_p1 = pnand %p613_p0, %p607_p7 }
  0x23   : > { %617 = shalt.err (!%p614_p1)
}
  0x24   : > { %s618_s26 = scalar_lea.vmem %s837_s11, 128  ;;  %s733_s30 = smov [#allocation3]  }
  0x25   : > { %p619_p2 = scmp.ne.s32.totalorder %s837_s11, %s618_s26  ;;  %s623_s5 = sshll.u32 %s733_s30, 4  ;;  %s624_s5 = int_to_ptr.vmem [resolvable:$false] %s623_s5 }
  0x26   : > { %s625_s6 = scalar_lea.vmem %s624_s5, 256  ;;  %p626_p11 = scmp.lt.s32.totalorder %s837_s11, %s624_s5 }
  0x27   : > { %p621_p4 = pnand %p619_p2, %p605_p3  ;;  %p627_p5 = scmp.lt.s32.totalorder %s625_s6, %s618_s26 }
  0x29   : > { %p622_p12 = pneg %p621_p4  ;;  %p628_p8 = por %p627_p5, %p626_p11 }
  0x2b   : > { %p629_p9 = pnand %p628_p8, %p622_p12 }
  0x2d   : > { %632 = shalt.err (!%p629_p9)
}
  0x2e   : > { %555 = dma.hbm_to_vmem [thread:$0]  (!%p833_p13), %s829_s9, 128, %s837_s11, %s170_s13  }
  0x2f   : > { %p979_p0 = scmp.lt.s32.totalorder %s731_s20, 3  ;;  %p980_p1 = scmp.ge.s32.totalorder %s731_s20, 1 }
  0x31   : > { %p186_p3 = pnand %p980_p1, %p979_p0 }
  0x32   : > { %s871_s7 = sand.u32 (!%p186_p3), 1, %s723_s18  }
  0x33   : > { %189 = sbr.rel (%p186_p3) target bundleno = 665 (0x299), region = 32  ;;  %s524_s8 = sshll.u32 (!%p186_p3), %s871_s7, 3 }
  0x34   : > { %s192_s10 = scalar_lea.sflag (!%p186_p3), [#allocation4], %s871_s7  ;;  %s195_s14 = scalar_lea.vmem (!%p186_p3), [#allocation3], %s524_s8 }
  0x3a   : > { %706 = dma.done.wait (%p809_p6), %s192_s10, 128  }
  0x3b   : > { %708 = vsyncadd (%p809_p6), %s192_s10, 4294967168  ;;  %v734_v0 = vmov 0.0   ;;  %vm735_vm0 = vmmov 0   ;;  %vm227_vm1 = vcmask 261120   ;;  %v223_v1 = vld [vmem:[%s195_s14] sm:$0xff]  ;;  %s225_s12 = sld [smem:[#allocation2]] }
  0x3c   : > { %536 = vmatprep.subr.mxu0 %v734_v0  ;;  %538 = vmatprep.mubr.msk.f32.mxu0 %vm735_vm0, %v734_v0  ;;  %v224_v2 = vld [vmem:[%s969_s1] sm:$0x1]  ;;  %vm304_vm2 = vcmask 57344   ;;  %vm315_vm3 = vcmask 64512   ;;  %s528_s27 = sshll.u32 %s787_s2, 4  ;;  %s222_s13 = scalar_lea.vmem [#allocation7], %s871_s7 }
  0x3d   : > { %541 = vmatprep.subr.mxu1 %v734_v0  ;;  %543 = vmatprep.mubr.msk.f32.mxu1 %vm735_vm0, %v734_v0  ;;  %s424_s15 = sshll.u32 %s222_s13, 4  ;;  %s891_s23 = scalar_lea.hbm %s972_s4, %s528_s27  ;;  %s893_s15 = int_to_ptr.vmem [resolvable:$true] %s424_s15 }
  0x3e   : > { %537 = vmatpush3.xpose.msk.msra.mxu0 %vm227_vm1, %v223_v1  ;;  %542 = vmatpush3.msra.mxu1 %v223_v1  ;;  %s399_s24 = scalar_lea.sflag [#allocation8], %s871_s7  ;;  %s633_s26 = scalar_lea.vmem %s893_s15, 16 }
  0x3f   : > { %p634_p6 = scmp.ne.s32.totalorder %s893_s15, %s633_s26  ;;  %p981_p11 = scmp.ne.s32.totalorder %s976_s28, 0 }
  0x40   : > { %s736_s30 = smov [#allocation7]  }
  0x41   : > { %539 = vmatmul.mubr.msk.f32.vlgmr.msra.gmra.mrb[0].mxu0 %vm227_vm1, %v224_v2  ;;  %v226_v3 = vstv %s225_s12  ;;  %p635_p12 = pnand %p634_p6, %p981_p11  ;;  %s637_s5 = sshll.u32 %s736_s30, 4  ;;  %s638_s5 = int_to_ptr.vmem [resolvable:$false] %s637_s5 }
  0x42   : > { %s639_s6 = scalar_lea.vmem %s638_s5, 32  ;;  %p640_p7 = scmp.lt.s32.totalorder %s893_s15, %s638_s5 }
  0x43   : > { %p636_p13 = pneg %p635_p12  ;;  %p641_p10 = scmp.lt.s32.totalorder %s639_s6, %s633_s26 }
  0x45   : > { %p642_p2 = por %p641_p10, %p640_p7 }
  0x47   : > { %p643_p4 = pnand %p642_p2, %p636_p13 }
 0x114   : > { %v300_v4 = vpop.f32.mrb[0].mxu0 }
 0x115   : > { %v301_v5 = vadd.f32 %v300_v4, %v226_v3  ;;  %v540_v6 = vpop.f32.mrb[1].mxu0 }
 0x117   : > { %v305_v7 = vsel %vm304_vm2, %v301_v5, -inf }
 0x118   : > { %306 = vmax.xlane.f32.xlu0 %v305_v7 }
 0x1a5   : > { %v307_v8 = vpop.xlane.xlu0 %306 }
 0x1a6   : > { %v308_v9 = vsub.f32 %v301_v5, %v307_v8 }
 0x1a8   : > { %v309_v10 = vmul.f32 1.442695, %v308_v9 }
 0x1aa   : > { %599 = vpow2.f32 %v309_v10 }
 0x1b4   : > { %v600_v11 = vpop.eup %599 }
 0x1b5   : > { %544 = vmatmul.mubr.msk.f32.vlgmr.msra.gmra.mrb[0].mxu1 %vm315_vm3, %v600_v11  ;;  %v311_v12 = vsel %vm304_vm2, %v600_v11, 0.0 }
 0x1b6   : > { %312 = vadd.xlane.f32.xlu0 %v311_v12 }
 0x243   : > { %v313_v13 = vpop.xlane.xlu0 %312 }
 0x244   : > { %601 = vrcp.f32 %v313_v13 }
 0x24e   : > { %v602_v14 = vpop.eup %601 }
 0x24f   : > { %v392_v15 = vmul.f32 %v602_v14, %v600_v11 }
 0x251   : > { %393 = vst.msk [vmem:[%s222_s13] sm:$0x1] %vm304_vm2, %v392_v15 }
 0x252   : > { %646 = shalt.err (!%p643_p4)
}
 0x253   : > { %s647_s8 = scalar_lea.hbm %s891_s23, 16  ;;  %s651_s9 = scalar_lea.hbm %s972_s4, 32 }
 0x254   : > { %p648_p5 = scmp.ne.s32.totalorder %s891_s23, %s647_s8  ;;  %p652_p0 = scmp.lt.u32.totalorder %s891_s23, %s972_s4 }
 0x255   : > { %p653_p1 = scmp.lt.u32.totalorder %s651_s9, %s647_s8  ;;  %p655_p6 = scmp.lt.u32.totalorder %s647_s8, %s891_s23 }
 0x256   : > { %p649_p8 = pnand %p648_p5, %p981_p11 }
 0x257   : > { %p654_p3 = por %p653_p1, %p652_p0 }
 0x258   : > { %p650_p9 = pneg %p649_p8 }
 0x259   : > { %p656_p12 = por %p655_p6, %p654_p3 }
 0x25b   : > { %p657_p13 = pnand %p656_p12, %p650_p9 }
 0x25d   : > { %660 = shalt.err (!%p657_p13)
}
 0x25e   : > { %549 = dma.vmem_to_hbm [thread:$0]  (%p981_p11), %s893_s15, 16, %s891_s23, %s399_s24   ;;  %vm390_vm4 = vcmask 253952  }
 0x25f   : > { %s216_s13 = scalar_lea.vmem [#allocation6], %s871_s7  ;;  %s924_s30 = scalar_lea.hbm %s971_s3, %s528_s27 }
 0x260   : > { %s411_s16 = sshll.u32 %s216_s13, 4  ;;  %s395_s5 = scalar_lea.sflag [#allocation5], %s871_s7  ;;  %s926_s16 = int_to_ptr.vmem [resolvable:$true] %s411_s16 }
 0x261   : > { %s661_s15 = scalar_lea.vmem %s926_s16, 16  ;;  %s737_s23 = smov [#allocation6]  }
 0x262   : > { %p662_p7 = scmp.ne.s32.totalorder %s926_s16, %s661_s15  ;;  %s665_s24 = sshll.u32 %s737_s23, 4  ;;  %s666_s24 = int_to_ptr.vmem [resolvable:$false] %s665_s24 }
 0x263   : > { %s667_s2 = scalar_lea.vmem %s666_s24, 32  ;;  %p668_p4 = scmp.lt.s32.totalorder %s926_s16, %s666_s24 }
 0x264   : > { %p663_p10 = pnand %p662_p7, %p981_p11  ;;  %p669_p5 = scmp.lt.s32.totalorder %s667_s2, %s661_s15 }
 0x266   : > { %p664_p2 = pneg %p663_p10  ;;  %p670_p8 = por %p669_p5, %p668_p4 }
 0x268   : > { %p671_p9 = pnand %p670_p8, %p664_p2 }
 0x288   : > { %v385_v16 = vpop.f32.mrb[0].mxu1 }
 0x289   : > { %v389_v17 = vmul.f32 %v602_v14, %v385_v16  ;;  %v545_v18 = vpop.f32.mrb[1].mxu1 }
 0x28b   : > { %391 = vst.msk [vmem:[%s216_s13] sm:$0x1] %vm390_vm4, %v389_v17 }
 0x28c   : > { %674 = shalt.err (!%p671_p9)
}
 0x28d   : > { %s675_s7 = scalar_lea.hbm %s924_s30, 16  ;;  %s679_s8 = scalar_lea.hbm %s971_s3, 32 }
 0x28e   : > { %p676_p0 = scmp.ne.s32.totalorder %s924_s30, %s675_s7  ;;  %p680_p6 = scmp.lt.u32.totalorder %s924_s30, %s971_s3 }
 0x28f   : > { %p681_p12 = scmp.lt.u32.totalorder %s679_s8, %s675_s7  ;;  %p683_p7 = scmp.lt.u32.totalorder %s675_s7, %s924_s30 }
 0x290   : > { %p677_p1 = pnand %p676_p0, %p981_p11 }
 0x291   : > { %p682_p13 = por %p681_p12, %p680_p6 }
 0x292   : > { %p678_p3 = pneg %p677_p1 }
 0x293   : > { %p684_p10 = por %p683_p7, %p682_p13 }
 0x295   : > { %p685_p2 = pnand %p684_p10, %p678_p3 }
 0x297   : > { %688 = shalt.err (!%p685_p2)
}
 0x298   : > { %548 = dma.vmem_to_hbm [thread:$0]  (%p981_p11), %s926_s16, 16, %s924_s30, %s395_s5  }
 0x299 PF: > { %s436_s9 = sand.u32 1, %s719_s17   ;;  %p982_p4 = scmp.ne.s32.totalorder %s977_s29, 0 }
 0x29a   : > { %p983_p5 = scmp.ge.s32.totalorder %s731_s20, 2  ;;  %s437_s11 = scalar_lea.sflag [#allocation5], %s436_s9 }
 0x29c   : > { %p557_p8 = pnand %p983_p5, %p982_p4 }
 0x29e   : > { %710 = dma.done.wait (!%p557_p8), %s437_s11, 16  }
 0x29f   : > { %712 = vsyncadd (!%p557_p8), %s437_s11, 4294967280  ;;  %s445_s12 = scalar_lea.sflag [#allocation8], %s436_s9 }
 0x2a0   : > { %714 = dma.done.wait (!%p557_p8), %s445_s12, 16  }
 0x2a1   : > { %716 = vsyncadd (!%p557_p8), %s445_s12, 4294967280  ;;  %p22_p11 = scmp.ge.s32.totalorder %s791_s22, 4   ;;  %s984_s17 = smov %s723_s18 }
 0x2a2   : > { %s985_s18 = smov %s727_s19  ;;  %s986_s19 = smov %s803_s25 }
 0x2a3   : > { %s987_s20 = smov %s791_s22  ;;  %24 = sbr.rel (!%p22_p11) target bundleno = 9 (0x9), region = 94 }
 0x2aa   :  { %449 = vsyncpa [#allocation4], 1 }
 0x2ab   :  { %451 = vsyncpa [#allocation4 + $0x1], 1 }
 0x2ac   :  { %452 = vsyncpa [#allocation5], 1 }
 0x2ad   :  { %454 = vsyncpa [#allocation5 + $0x1], 1 }
 0x2ae   :  { %455 = vsyncpa [#allocation8], 1 }
 0x2af   :  { %457 = vsyncpa [#allocation8 + $0x1], 1 }

</bundles_post_ra>
